<compile_context>
chip_gen: v7x
topology: tpu7x:2x2x1
jax: 0.10.0
libtpu: 0.0.40
codegen_flags: <defaults>
</compile_context>

<pallas_src>
import functools

import numpy as np
import jax
import jax.numpy as jnp
from jax.experimental import pallas as pl
from jax.experimental.pallas import tpu as pltpu


HIDDEN = 64
MAX_TILE_N = 2048  # rows per grid step at large batch (multiple of 128)


def _round_up(x, m):
    return ((x + m - 1) // m) * m


def _critic_kernel(x_ref,
                   w1_ref, b1_ref,
                   w2_ref, b2_ref,
                   w3_ref, b3_ref,
                   wh_ref, bh_ref,
                   out_ref,
                   *, tanh_in_cdt):
    """One batch tile: 3-layer tanh trunk + fused (narrow, zero-padded) head matmul."""
    cdt = w1_ref.dtype  # compute dtype fed to the MXU (f32 or bf16)

    def layer(h, w_ref, b_ref):
        # MXU matmul with f32 accumulation; bias add in f32.
        y = jnp.dot(h, w_ref[...], preferred_element_type=jnp.float32) + b_ref[...]
        if tanh_in_cdt:
            # bf16 tanh (v6e/v7x EUP runs bf16 ~2x f32); next matmul consumes bf16.
            return jnp.tanh(y.astype(cdt))
        # f32 tanh (v5e, or f32 compute); cast only if the MXU wants bf16.
        return jnp.tanh(y).astype(cdt)

    h = layer(x_ref[...], w1_ref, b1_ref)
    h = layer(h, w2_ref, b2_ref)
    h = layer(h, w3_ref, b3_ref)

    # Fused heads: single narrow [TILE_N, head_pad] store (gen | BES | AC | zero-pad).
    out_ref[...] = (jnp.dot(h, wh_ref[...], preferred_element_type=jnp.float32)
                    + bh_ref[...]).astype(out_ref.dtype)


def _choose_tile_n(n):
    """Rows per grid step.

    Tiny batches: one step holding the whole (8-padded) batch (per-step overhead
    would dominate). Otherwise split into >= 2 steps of 128-multiples so v7x's two
    TensorCores both get work, capped at MAX_TILE_N.
    """
    n_pad8 = max(8, _round_up(n, 8))
    if n_pad8 <= 256:
        return n_pad8
    half = _round_up(pl.cdiv(n_pad8, 2), 128)
    return min(half, MAX_TILE_N)


def prepare_critic_params(params, compute_dtype=jnp.float32):
    """Fuse the three value heads into one narrow lane slab and cast weights once.

    Returns a dict consumable by `critic_forward`; do this once per set of weights,
    not per forward call.
    """
    num_ac = params["wa"].shape[1]
    num_heads = 2 + num_ac                      # gen | BES | AC
    head_pad = max(8, _round_up(num_heads, 8))  # narrow, sublane-aligned output width

    wh = jnp.concatenate([params["wg"], params["wb"], params["wa"]], axis=1)
    bh = jnp.concatenate([params["bg"], params["bb"], params["ba"]], axis=1)
    if head_pad != num_heads:
        wh = jnp.pad(wh, ((0, 0), (0, head_pad - num_heads)))
        bh = jnp.pad(bh, ((0, 0), (0, head_pad - num_heads)))

    cdt = jnp.dtype(compute_dtype)
    return {
        "w1": params["w1"].astype(cdt), "b1": params["b1"].astype(jnp.float32),
        "w2": params["w2"].astype(cdt), "b2": params["b2"].astype(jnp.float32),
        "w3": params["w3"].astype(cdt), "b3": params["b3"].astype(jnp.float32),
        "wh": wh.astype(cdt), "bh": bh.astype(jnp.float32),
        "num_heads": num_heads, "num_ac": num_ac, "head_pad": head_pad,
        "compute_dtype": cdt,
    }


def critic_forward(x, params, compute_dtype=jnp.float32, tanh_in_compute_dtype=None):
    """Run the Critic forward pass as a single batch-tiled Pallas kernel.

    Args:
      x: [N, num_observations] float32 (or bf16).
      params: raw params from `init_critic_params`, or prepared params from
        `prepare_critic_params` (preferred: avoids per-call concat/pad/cast).
      compute_dtype: dtype fed to the MXU when `params` are raw (f32 or bf16);
        accumulation and bias adds are always f32.
      tanh_in_compute_dtype: run tanh in the compute dtype (good on v6e/v7x bf16;
        set False on v5e, which has no bf16 EUP). Defaults to True iff bf16.
    Returns:
      (gen_value [N,1], BES_value [N,1], AC_values [N,num_AC]) in float32.
    """
    if "wh" not in params:
        params = prepare_critic_params(params, compute_dtype)
    cdt = params["compute_dtype"]
    if tanh_in_compute_dtype is None:
        tanh_in_compute_dtype = (cdt == jnp.bfloat16)

    n, num_obs = x.shape
    num_heads = params["num_heads"]
    num_ac = params["num_ac"]
    head_pad = params["head_pad"]

    # --- batch tiling / padding (cast before pad so the pad writes narrow dtype) ---
    tile_n = _choose_tile_n(n)
    grid = (pl.cdiv(max(n, 1), tile_n),)
    n_pad = grid[0] * tile_n
    x_p = x.astype(cdt) if x.dtype != cdt else x
    if n_pad != n:
        x_p = jnp.pad(x_p, ((0, n_pad - n), (0, 0)))

    # weights/biases: constant index_map -> resident in VMEM for the whole grid
    def _resident(shape):
        return pl.BlockSpec(shape, lambda i: (0, 0))

    in_specs = [
        pl.BlockSpec((tile_n, num_obs), lambda i: (i, 0)),   # x tile (row-pipelined)
        _resident((num_obs, HIDDEN)), _resident((1, HIDDEN)),
        _resident((HIDDEN, HIDDEN)), _resident((1, HIDDEN)),
        _resident((HIDDEN, HIDDEN)), _resident((1, HIDDEN)),
        _resident((HIDDEN, head_pad)), _resident((1, head_pad)),
    ]
    out_spec = pl.BlockSpec((tile_n, head_pad), lambda i: (i, 0))

    # advisory cost estimate so XLA schedules surrounding ops sensibly
    itemsize = cdt.itemsize
    flops = 2 * n_pad * (num_obs * HIDDEN + 2 * HIDDEN * HIDDEN + HIDDEN * head_pad)
    bytes_accessed = (n_pad * num_obs * itemsize
                      + (num_obs * HIDDEN + 2 * HIDDEN * HIDDEN + HIDDEN * head_pad) * itemsize
                      + (3 * HIDDEN + head_pad) * 4
                      + n_pad * head_pad * 4)
    cost = pl.CostEstimate(flops=flops,
                           transcendentals=3 * n_pad * HIDDEN,
                           bytes_accessed=bytes_accessed)

    out = pl.pallas_call(
        functools.partial(_critic_kernel, tanh_in_cdt=bool(tanh_in_compute_dtype)),
        out_shape=jax.ShapeDtypeStruct((n_pad, head_pad), jnp.float32),
        grid=grid,
        in_specs=in_specs,
        out_specs=out_spec,
        compiler_params=pltpu.CompilerParams(
            dimension_semantics=("parallel",),   # shard batch tiles across TCs (v7x)
        ),
        cost_estimate=cost,
    )(x_p,
      params["w1"], params["b1"],
      params["w2"], params["b2"],
      params["w3"], params["b3"],
      params["wh"], params["bh"])

    # one contiguous narrow slice, then split gen / BES / AC
    heads = out[:n, :num_heads]
    gen_v = heads[:, 0:1]
    bes_v = heads[:, 1:2]
    ac_v = heads[:, 2:2 + num_ac]
    return gen_v, bes_v, ac_v


def _orthogonal(key, shape, gain):
    """Deterministic orthogonal init (matches nn.init.orthogonal_ semantics)."""
    rows, cols = shape
    flat = jax.random.normal(key, (max(rows, cols), min(rows, cols)), jnp.float32)
    q, r = jnp.linalg.qr(flat)
    d = jnp.diag(r)
    q = q * jnp.where(d >= 0, 1.0, -1.0)  # sign fix, robust to d == 0
    if rows < cols:
        q = q.T
    return gain * q[:rows, :cols]


def init_critic_params(key, num_observations, num_ac):
    gain = float(np.sqrt(2.0))
    keys = jax.random.split(key, 6)
    # PyTorch Linear weight is [out, in]; we store transposed [in, out].
    w1 = _orthogonal(keys[0], (HIDDEN, num_observations), gain).T
    w2 = _orthogonal(keys[1], (HIDDEN, HIDDEN), gain).T
    w3 = _orthogonal(keys[2], (HIDDEN, HIDDEN), gain).T
    wg = _orthogonal(keys[3], (1, HIDDEN), gain).T
    wb = _orthogonal(keys[4], (1, HIDDEN), gain).T
    wa = _orthogonal(keys[5], (num_ac, HIDDEN), gain).T
    return {
        "w1": jnp.asarray(w1, jnp.float32), "b1": jnp.zeros((1, HIDDEN), jnp.float32),
        "w2": jnp.asarray(w2, jnp.float32), "b2": jnp.zeros((1, HIDDEN), jnp.float32),
        "w3": jnp.asarray(w3, jnp.float32), "b3": jnp.zeros((1, HIDDEN), jnp.float32),
        "wg": jnp.asarray(wg, jnp.float32), "bg": jnp.zeros((1, 1), jnp.float32),
        "wb": jnp.asarray(wb, jnp.float32), "bb": jnp.zeros((1, 1), jnp.float32),
        "wa": jnp.asarray(wa, jnp.float32), "ba": jnp.zeros((1, num_ac), jnp.float32),
    }


def _reference_forward(x, p):
    h = jnp.tanh(x @ p["w1"] + p["b1"])
    h = jnp.tanh(h @ p["w2"] + p["b2"])
    h = jnp.tanh(h @ p["w3"] + p["b3"])
    return (h @ p["wg"] + p["bg"], h @ p["wb"] + p["bb"], h @ p["wa"] + p["ba"])


if __name__ == "__main__":
    num_observations = 16
    num_ac = 4
    batch = 8

    key = jax.random.PRNGKey(0)
    kx, kp = jax.random.split(key)
    x = jax.random.normal(kx, (batch, num_observations), jnp.float32)
    params = init_critic_params(kp, num_observations, num_ac)

    # f32 path (prepared params; strict check vs. pure-JAX reference)
    prepared_f32 = prepare_critic_params(params, jnp.float32)
    gen_v, bes_v, ac_v = jax.block_until_ready(critic_forward(x, prepared_f32))

    ref_gen, ref_bes, ref_ac = _reference_forward(x, params)
    np.testing.assert_allclose(np.asarray(gen_v), np.asarray(ref_gen), rtol=1e-5, atol=1e-5)
    np.testing.assert_allclose(np.asarray(bes_v), np.asarray(ref_bes), rtol=1e-5, atol=1e-5)
    np.testing.assert_allclose(np.asarray(ac_v), np.asarray(ref_ac), rtol=1e-5, atol=1e-5)

    assert gen_v.shape == (batch, 1)
    assert bes_v.shape == (batch, 1)
    assert ac_v.shape == (batch, num_ac)

    # batch spanning multiple grid steps (tiled / pipelined path, >= 2 steps)
    big = jax.random.normal(kx, (2 * MAX_TILE_N + 37, num_observations), jnp.float32)
    bg, bb_, ba_ = jax.block_until_ready(critic_forward(big, prepared_f32))
    rg, rb, ra = _reference_forward(big, params)
    np.testing.assert_allclose(np.asarray(bg), np.asarray(rg), rtol=1e-5, atol=1e-5)
    np.testing.assert_allclose(np.asarray(bb_), np.asarray(rb), rtol=1e-5, atol=1e-5)
    np.testing.assert_allclose(np.asarray(ba_), np.asarray(ra), rtol=1e-5, atol=1e-5)

    # mid-size batch exercising the >=2-step split path (v7x dual-TC sharding)
    mid = jax.random.normal(kx, (300, num_observations), jnp.float32)
    mg, mb, ma = jax.block_until_ready(critic_forward(mid, prepared_f32))
    rmg, rmb, rma = _reference_forward(mid, params)
    np.testing.assert_allclose(np.asarray(mg), np.asarray(rmg), rtol=1e-5, atol=1e-5)
    np.testing.assert_allclose(np.asarray(ma), np.asarray(rma), rtol=1e-5, atol=1e-5)

    # bf16 MXU path with bf16 tanh (recommended on v6e/v7x); looser tolerance
    prepared_bf16 = prepare_critic_params(params, jnp.bfloat16)
    g16, b16, a16 = jax.block_until_ready(critic_forward(x, prepared_bf16))
    np.testing.assert_allclose(np.asarray(g16), np.asarray(ref_gen), rtol=3e-2, atol=3e-2)
    np.testing.assert_allclose(np.asarray(a16), np.asarray(ref_ac), rtol=3e-2, atol=3e-2)

    # bf16 MXU path with f32 tanh (recommended on v5e: no bf16 EUP)
    g16f, _, a16f = jax.block_until_ready(
        critic_forward(x, prepared_bf16, tanh_in_compute_dtype=False))
    np.testing.assert_allclose(np.asarray(g16f), np.asarray(ref_gen), rtol=3e-2, atol=3e-2)

    print("KERNEL_OK")
</pallas_src>

<mosaic_0001>
module attributes {stable_mosaic.version = 11 : i64} {
  func.func @_critic_kernel(%arg0: i32, %arg1: memref<8x16xf32, #tpu.memory_space<vmem>>, %arg2: memref<16x64xf32, #tpu.memory_space<vmem>>, %arg3: memref<1x64xf32, #tpu.memory_space<vmem>>, %arg4: memref<64x64xf32, #tpu.memory_space<vmem>>, %arg5: memref<1x64xf32, #tpu.memory_space<vmem>>, %arg6: memref<64x64xf32, #tpu.memory_space<vmem>>, %arg7: memref<1x64xf32, #tpu.memory_space<vmem>>, %arg8: memref<64x8xf32, #tpu.memory_space<vmem>>, %arg9: memref<1x8xf32, #tpu.memory_space<vmem>>, %arg10: memref<8x8xf32, #tpu.memory_space<vmem>>) attributes {dimension_semantics = [#tpu.dimension_semantics<parallel>], iteration_bounds = array<i64: 1>, scalar_prefetch = 0 : i64, scratch_operands = 0 : i64, tpu.core_type = #tpu.core_type<tc>, window_params = [{transform_indices = @transform_0, window_bounds = array<i64: 8, 16>}, {pipeline_mode = #tpu.pipeline_mode<synchronous>, transform_indices = @transform_1, window_bounds = array<i64: 16, 64>}, {pipeline_mode = #tpu.pipeline_mode<synchronous>, transform_indices = @transform_2, window_bounds = array<i64: 1, 64>}, {pipeline_mode = #tpu.pipeline_mode<synchronous>, transform_indices = @transform_3, window_bounds = array<i64: 64, 64>}, {pipeline_mode = #tpu.pipeline_mode<synchronous>, transform_indices = @transform_4, window_bounds = array<i64: 1, 64>}, {pipeline_mode = #tpu.pipeline_mode<synchronous>, transform_indices = @transform_5, window_bounds = array<i64: 64, 64>}, {pipeline_mode = #tpu.pipeline_mode<synchronous>, transform_indices = @transform_6, window_bounds = array<i64: 1, 64>}, {pipeline_mode = #tpu.pipeline_mode<synchronous>, transform_indices = @transform_7, window_bounds = array<i64: 64, 8>}, {pipeline_mode = #tpu.pipeline_mode<synchronous>, transform_indices = @transform_8, window_bounds = array<i64: 1, 8>}, {transform_indices = @transform_9, window_bounds = array<i64: 8, 8>}]} {
    %c0 = arith.constant 0 : index
    %c0_0 = arith.constant 0 : index
    %0 = vector.load %arg1[%c0, %c0_0] : memref<8x16xf32, #tpu.memory_space<vmem>>, vector<8x16xf32>
    %c0_1 = arith.constant 0 : index
    %c0_2 = arith.constant 0 : index
    %1 = vector.load %arg2[%c0_1, %c0_2] : memref<16x64xf32, #tpu.memory_space<vmem>>, vector<16x64xf32>
    %cst = arith.constant dense<0.000000e+00> : vector<8x64xf32>
    %2 = tpu.matmul %0, %1, %cst {dimension_numbers = #tpu.dot_dimension_numbers<[1], [0], [0], [1], [0, 0, 1, 1], [], []>} : vector<8x16xf32>, vector<16x64xf32>, vector<8x64xf32> -> vector<8x64xf32>
    %c0_3 = arith.constant 0 : index
    %c0_4 = arith.constant 0 : index
    %3 = vector.load %arg3[%c0_3, %c0_4] : memref<1x64xf32, #tpu.memory_space<vmem>>, vector<1x64xf32>
    %4 = vector.broadcast %3 : vector<1x64xf32> to vector<8x64xf32>
    %5 = arith.addf %2, %4 : vector<8x64xf32>
    %6 = math.tanh %5 : vector<8x64xf32>
    %c0_5 = arith.constant 0 : index
    %c0_6 = arith.constant 0 : index
    %7 = vector.load %arg4[%c0_5, %c0_6] : memref<64x64xf32, #tpu.memory_space<vmem>>, vector<64x64xf32>
    %cst_7 = arith.constant dense<0.000000e+00> : vector<8x64xf32>
    %8 = tpu.matmul %6, %7, %cst_7 {dimension_numbers = #tpu.dot_dimension_numbers<[1], [0], [0], [1], [0, 0, 1, 1], [], []>} : vector<8x64xf32>, vector<64x64xf32>, vector<8x64xf32> -> vector<8x64xf32>
    %c0_8 = arith.constant 0 : index
    %c0_9 = arith.constant 0 : index
    %9 = vector.load %arg5[%c0_8, %c0_9] : memref<1x64xf32, #tpu.memory_space<vmem>>, vector<1x64xf32>
    %10 = vector.broadcast %9 : vector<1x64xf32> to vector<8x64xf32>
    %11 = arith.addf %8, %10 : vector<8x64xf32>
    %12 = math.tanh %11 : vector<8x64xf32>
    %c0_10 = arith.constant 0 : index
    %c0_11 = arith.constant 0 : index
    %13 = vector.load %arg6[%c0_10, %c0_11] : memref<64x64xf32, #tpu.memory_space<vmem>>, vector<64x64xf32>
    %cst_12 = arith.constant dense<0.000000e+00> : vector<8x64xf32>
    %14 = tpu.matmul %12, %13, %cst_12 {dimension_numbers = #tpu.dot_dimension_numbers<[1], [0], [0], [1], [0, 0, 1, 1], [], []>} : vector<8x64xf32>, vector<64x64xf32>, vector<8x64xf32> -> vector<8x64xf32>
    %c0_13 = arith.constant 0 : index
    %c0_14 = arith.constant 0 : index
    %15 = vector.load %arg7[%c0_13, %c0_14] : memref<1x64xf32, #tpu.memory_space<vmem>>, vector<1x64xf32>
    %16 = vector.broadcast %15 : vector<1x64xf32> to vector<8x64xf32>
    %17 = arith.addf %14, %16 : vector<8x64xf32>
    %18 = math.tanh %17 : vector<8x64xf32>
    %c0_15 = arith.constant 0 : index
    %c0_16 = arith.constant 0 : index
    %19 = vector.load %arg8[%c0_15, %c0_16] : memref<64x8xf32, #tpu.memory_space<vmem>>, vector<64x8xf32>
    %cst_17 = arith.constant dense<0.000000e+00> : vector<8x8xf32>
    %20 = tpu.matmul %18, %19, %cst_17 {dimension_numbers = #tpu.dot_dimension_numbers<[1], [0], [0], [1], [0, 0, 1, 1], [], []>} : vector<8x64xf32>, vector<64x8xf32>, vector<8x8xf32> -> vector<8x8xf32>
    %c0_18 = arith.constant 0 : index
    %c0_19 = arith.constant 0 : index
    %21 = vector.load %arg9[%c0_18, %c0_19] : memref<1x8xf32, #tpu.memory_space<vmem>>, vector<1x8xf32>
    %22 = vector.broadcast %21 : vector<1x8xf32> to vector<8x8xf32>
    %23 = arith.addf %20, %22 : vector<8x8xf32>
    %c0_20 = arith.constant 0 : index
    %c0_21 = arith.constant 0 : index
    %24 = vector.load %arg10[%c0_20, %c0_21] : memref<8x8xf32, #tpu.memory_space<vmem>>, vector<8x8xf32>
    tpu.vector_store %arg10[%c0_20, %c0_21], %23 {strides = array<i32>} : memref<8x8xf32, #tpu.memory_space<vmem>>, vector<8x8xf32>,
    return
  }
  func.func @transform_0(%arg0: i32) -> (i32, i32) {
    %c0_i32 = arith.constant 0 : i32
    %c0_i32_0 = arith.constant 0 : i32
    return %arg0, %c0_i32 : i32, i32
  }
  func.func @transform_1(%arg0: i32) -> (i32, i32) {
    %c0_i32 = arith.constant 0 : i32
    %c0_i32_0 = arith.constant 0 : i32
    %c0_i32_1 = arith.constant 0 : i32
    return %c0_i32, %c0_i32_0 : i32, i32
  }
  func.func @transform_2(%arg0: i32) -> (i32, i32) {
    %c0_i32 = arith.constant 0 : i32
    %c0_i32_0 = arith.constant 0 : i32
    %c0_i32_1 = arith.constant 0 : i32
    return %c0_i32, %c0_i32_0 : i32, i32
  }
  func.func @transform_3(%arg0: i32) -> (i32, i32) {
    %c0_i32 = arith.constant 0 : i32
    %c0_i32_0 = arith.constant 0 : i32
    %c0_i32_1 = arith.constant 0 : i32
    return %c0_i32, %c0_i32_0 : i32, i32
  }
  func.func @transform_4(%arg0: i32) -> (i32, i32) {
    %c0_i32 = arith.constant 0 : i32
    %c0_i32_0 = arith.constant 0 : i32
    %c0_i32_1 = arith.constant 0 : i32
    return %c0_i32, %c0_i32_0 : i32, i32
  }
  func.func @transform_5(%arg0: i32) -> (i32, i32) {
    %c0_i32 = arith.constant 0 : i32
    %c0_i32_0 = arith.constant 0 : i32
    %c0_i32_1 = arith.constant 0 : i32
    return %c0_i32, %c0_i32_0 : i32, i32
  }
  func.func @transform_6(%arg0: i32) -> (i32, i32) {
    %c0_i32 = arith.constant 0 : i32
    %c0_i32_0 = arith.constant 0 : i32
    %c0_i32_1 = arith.constant 0 : i32
    return %c0_i32, %c0_i32_0 : i32, i32
  }
  func.func @transform_7(%arg0: i32) -> (i32, i32) {
    %c0_i32 = arith.constant 0 : i32
    %c0_i32_0 = arith.constant 0 : i32
    %c0_i32_1 = arith.constant 0 : i32
    return %c0_i32, %c0_i32_0 : i32, i32
  }
  func.func @transform_8(%arg0: i32) -> (i32, i32) {
    %c0_i32 = arith.constant 0 : i32
    %c0_i32_0 = arith.constant 0 : i32
    %c0_i32_1 = arith.constant 0 : i32
    return %c0_i32, %c0_i32_0 : i32, i32
  }
  func.func @transform_9(%arg0: i32) -> (i32, i32) {
    %c0_i32 = arith.constant 0 : i32
    %c0_i32_0 = arith.constant 0 : i32
    return %arg0, %c0_i32 : i32, i32
  }
}

</mosaic_0001>

<bundles_post_ra>
// kernel: tpu_custom_call.1
= control target key start
LH: loop header
LB: loop body
LE: loop exit
PB: predicated region body
PF: predicated region fallthrough
CT: control target
= control target key end

     0   :  { %14 = vsyncpa [#allocation3], 0  ;;  %s843_s0 = inlined_call_operand.hbm [shape: f32[8,16], index: 0, kind: input, shape index: {}]   ;;  %s844_s1 = inlined_call_operand.vmem [shape: f32[16,64], index: 1, kind: input, shape index: {}]   ;;  %s845_s2 = inlined_call_operand.vmem [shape: f32[1,64], index: 2, kind: input, shape index: {}]   ;;  %s846_s3 = inlined_call_operand.vmem [shape: f32[64,64], index: 3, kind: input, shape index: {}]   ;;  %s847_s4 = inlined_call_operand.vmem [shape: f32[1,64], index: 4, kind: input, shape index: {}]   ;;  %s848_s5 = inlined_call_operand.hbm [shape: f32[64,64], index: 5, kind: input, shape index: {}]   ;;  %s849_s6 = inlined_call_operand.vmem [shape: f32[1,64], index: 6, kind: input, shape index: {}]   ;;  %s850_s7 = inlined_call_operand.vmem [shape: f32[64,8], index: 7, kind: input, shape index: {}]   ;;  %s851_s8 = inlined_call_operand.vmem [shape: f32[1,8], index: 8, kind: input, shape index: {}]   ;;  %s852_s9 = inlined_call_operand.hbm [shape: f32[8,8], index: 9, kind: output, shape index: {}]  }
   0x1   :  { %15 = vsyncpa [#allocation6], 0 }
   0x2   :  { %16 = vsyncpa [#allocation4], 0  ;;  %s656_s30 = smov [#allocation2]   ;;  %s657_s11 = smov [#allocation5]  }
   0x3   :  { %s23_s10 = sshll.u32 %s656_s30, 4  ;;  %s40_s12 = sshll.u32 %s657_s11, 4  ;;  %s24_s10 = int_to_ptr.vmem [resolvable:$true] %s23_s10  ;;  %s714_s12 = int_to_ptr.vmem [resolvable:$true] %s40_s12 }
   0x4   :  { %s584_s15 = scalar_lea.hbm %s843_s0, 128 }
   0x5   :  { %p585_p0 = scmp.ne.s32.totalorder %s843_s0, %s584_s15  ;;  %p588_p1 = scmp.lt.u32.totalorder %s584_s15, %s843_s0 }
   0x7   :  { %p590_p2 = pnand %p588_p1, %p585_p0 }
   0x9   :  { %593 = shalt.err (!%p590_p2)
}
   0xa   :  { %s594_s20 = scalar_lea.vmem %s24_s10, 128  ;;  %p599_p4 = scmp.lt.s32.totalorder %s24_s10, %s24_s10 }
   0xb   :  { %p595_p3 = scmp.ne.s32.totalorder %s24_s10, %s594_s20  ;;  %p600_p5 = scmp.lt.s32.totalorder %s594_s20, %s594_s20 }
   0xd   :  { %p601_p6 = por %p600_p5, %p599_p4 }
   0xf   :  { %p602_p7 = pnand %p601_p6, %p595_p3 }
  0x11   :  { %605 = shalt.err (!%p602_p7)
}
  0x12   :  { %26 = dma.hbm_to_vmem [thread:$0]  %s843_s0, 128, %s24_s10, [#allocation3]  }
  0x13   :  { %s606_s25 = scalar_lea.hbm %s848_s5, 1024 }
  0x14   :  { %p607_p8 = scmp.ne.s32.totalorder %s848_s5, %s606_s25  ;;  %p610_p9 = scmp.lt.u32.totalorder %s606_s25, %s848_s5 }
  0x16   :  { %p612_p10 = pnand %p610_p9, %p607_p8 }
  0x18   :  { %615 = shalt.err (!%p612_p10)
}
  0x19   :  { %s616_s30 = scalar_lea.vmem %s714_s12, 1024  ;;  %p621_p12 = scmp.lt.s32.totalorder %s714_s12, %s714_s12 }
  0x1a   :  { %p617_p11 = scmp.ne.s32.totalorder %s714_s12, %s616_s30  ;;  %p622_p13 = scmp.lt.s32.totalorder %s616_s30, %s616_s30 }
  0x1c   :  { %p623_p0 = por %p622_p13, %p621_p12 }
  0x1e   :  { %p624_p1 = pnand %p623_p0, %p617_p11 }
  0x20   :  { %627 = shalt.err (!%p624_p1)
}
  0x21   :  { %s658_s0 = smov 128   ;;  %s659_s10 = smov 8  }
  0x22   :  { %46 = dma.hbm_to_vmem [thread:$0]  %s848_s5, 1024, %s714_s12, [#allocation6], %s658_s0, %s658_s0, %s659_s10  }
  0x23   :  { %650 = dma.done.wait [#allocation3], 128  }
  0x24   :  { %651 = vsyncadd [#allocation3], 4294967168 }
  0x25   :  { %652 = dma.done.wait [#allocation6], 1024  }
  0x26   :  { %653 = vsyncadd [#allocation6], 4294966272  ;;  %v660_v0 = vmov 0.0|0.0   ;;  %vm661_vm0 = vmmov 0   ;;  %v662_v1 = vmov 0.0   ;;  %v60_v2 = vld [vmem:[%s844_s1] sm:$0xff] }
  0x27   :  { %531 = vmatprep.subr.bf16.mxu0 %v660_v0  ;;  %471 = vmatprep.mubr.msk.f32.mxu0 %vm661_vm0, %v662_v1  ;;  %v61_v3 = vld [vmem:[%s844_s1 + $0x8] sm:$0xff]  ;;  %v144_v5 = vld [vmem:[%s846_s3] sm:$0xff]  ;;  %vm69_vm1 = vcmask 130048   ;;  %v146_v9 = vld [vmem:[%s846_s3 + $0x10] sm:$0xff]  ;;  %vm159_vm2 = vcmask 523264   ;;  %vm411_vm3 = vcmask 64512  }
  0x28   :  { %534 = vmatprep.subr.bf16.mxu1 %v660_v0  ;;  %490 = vmatprep.mubr.msk.f32.mxu1 %vm661_vm0, %v662_v1  ;;  %v532_v4 = vpack.c.bf16 %v61_v3, %v60_v2  ;;  %v145_v6 = vld [vmem:[%s846_s3 + $0x8] sm:$0xff]  ;;  %v59_v8 = vld [vmem:[#allocation2] sm:$0xff]  ;;  %v147_v10 = vld [vmem:[%s846_s3 + $0x18] sm:$0xff] }
  0x29   :  { %v535_v7 = vpack.c.bf16 %v145_v6, %v144_v5  ;;  %v538_v11 = vpack.c.bf16 %v147_v10, %v146_v9  ;;  %v148_v12 = vld [vmem:[%s846_s3 + $0x20] sm:$0xff]  ;;  %v149_v13 = vld [vmem:[%s846_s3 + $0x28] sm:$0xff]  ;;  %v150_v15 = vld [vmem:[%s846_s3 + $0x30] sm:$0xff] }
  0x2a   :  { %533 = vmatpush3.bf16.msra.mxu0 %v532_v4  ;;  %v541_v14 = vpack.c.bf16 %v149_v13, %v148_v12  ;;  %v151_v16 = vld [vmem:[%s846_s3 + $0x38] sm:$0xff]  ;;  %v234_v18 = vld [vmem:[#allocation5] sm:$0xff]  ;;  %v235_v19 = vld [vmem:[#allocation5 + $0x8] sm:$0xff] }
  0x2b   :  { %536 = vmatpush3.bf16.msra.mxu1 %v535_v7  ;;  %546 = vmatprep.subr.bf16.mxu0 %v660_v0  ;;  %v544_v17 = vpack.c.bf16 %v151_v16, %v150_v15  ;;  %v547_v20 = vpack.c.bf16 %v235_v19, %v234_v18  ;;  %v429_v21 = vld [vmem:[%s845_s2] ss:$0 sm:$0xff]  ;;  %v236_v26 = vld [vmem:[#allocation5 + $0x10] sm:$0xff]  ;;  %v238_v29 = vld [vmem:[#allocation5 + $0x20] sm:$0xff] }
  0x2c   :  { %537 = vmatprep.subr.bf16.mxu1 %v660_v0  ;;  %v237_v27 = vld [vmem:[#allocation5 + $0x18] sm:$0xff]  ;;  %v239_v30 = vld [vmem:[#allocation5 + $0x28] sm:$0xff]  ;;  %v240_v32 = vld [vmem:[#allocation5 + $0x30] sm:$0xff] }
  0x2d   :  { %472 = vmatmul.mubr.msk.f32.vlgmr.msra.gmra.mrb[0].mxu0 %vm69_vm1, %v59_v8  ;;  %v550_v28 = vpack.c.bf16 %v237_v27, %v236_v26  ;;  %v553_v31 = vpack.c.bf16 %v239_v30, %v238_v29  ;;  %v241_v33 = vld [vmem:[#allocation5 + $0x38] sm:$0xff]  ;;  %v324_v36 = vld [vmem:[%s850_s7 + $0x8] sm:$0xff]  ;;  %v325_v43 = vld [vmem:[%s850_s7 + $0x10] sm:$0xff] }
  0x2e   :  { %509 = vmatprep.mubr.msk.f32.mxu0 %vm661_vm0, %v662_v1  ;;  %548 = vmatpush3.bf16.msra.mxu0 %v547_v20  ;;  %v556_v34 = vpack.c.bf16 %v241_v33, %v240_v32  ;;  %v323_v35 = vld [vmem:[%s850_s7] sm:$0xff]  ;;  %v326_v44 = vld [vmem:[%s850_s7 + $0x18] sm:$0xff]  ;;  %v328_v47 = vld [vmem:[%s850_s7 + $0x28] sm:$0xff] }
  0x2f   :  { %539 = vmatpush3.bf16.msra.mxu1 %v538_v11  ;;  %549 = vmatprep.subr.bf16.mxu0 %v660_v0  ;;  %v559_v37 = vpack.c.bf16 %v324_v36, %v323_v35  ;;  %v431_v38 = vld [vmem:[%s847_s4] ss:$0 sm:$0xff]  ;;  %v562_v45 = vpack.c.bf16 %v326_v44, %v325_v43  ;;  %v329_v49 = vld [vmem:[%s850_s7 + $0x30] sm:$0xff]  ;;  %v330_v50 = vld [vmem:[%s850_s7 + $0x38] sm:$0xff] }
  0x30   :  { %540 = vmatprep.subr.bf16.mxu1 %v660_v0  ;;  %v327_v46 = vld [vmem:[%s850_s7 + $0x20] sm:$0xff]  ;;  %v568_v51 = vpack.c.bf16 %v330_v50, %v329_v49  ;;  %s663_s7 = smov [#allocation7]  }
  0x31   :  { %v565_v48 = vpack.c.bf16 %v328_v47, %v327_v46  ;;  %v433_v52 = vld [vmem:[%s849_s6] ss:$0 sm:$0xff]  ;;  %s419_s28 = sshll.u32 %s663_s7, 4  ;;  %s420_s28 = int_to_ptr.vmem [resolvable:$true] %s419_s28 }
  0x32   :  { %551 = vmatpush3.bf16.msra.mxu0 %v550_v28  ;;  %v435_v57 = vld [vmem:[%s851_s8] ss:$0 sm:$0xff]  ;;  %s628_s6 = scalar_lea.vmem %s420_s28, 128  ;;  %p633_p3 = scmp.lt.s32.totalorder %s420_s28, %s420_s28 }
  0x33   :  { %542 = vmatpush3.bf16.msra.mxu1 %v541_v14  ;;  %552 = vmatprep.subr.bf16.mxu0 %v660_v0  ;;  %p629_p2 = scmp.ne.s32.totalorder %s420_s28, %s628_s6  ;;  %p634_p4 = scmp.lt.s32.totalorder %s628_s6, %s628_s6 }
  0x34   :  { %543 = vmatprep.subr.bf16.mxu1 %v660_v0 }
  0x35   :  { %p635_p5 = por %p634_p4, %p633_p3 }
  0x36   :  { %554 = vmatpush3.bf16.msra.mxu0 %v553_v31 }
  0x37   :  { %545 = vmatpush3.bf16.msra.mxu1 %v544_v17  ;;  %555 = vmatprep.subr.bf16.mxu0 %v660_v0  ;;  %p636_p6 = pnand %p635_p5, %p629_p2 }
  0x38   :  { %558 = vmatprep.subr.bf16.mxu1 %v660_v0 }
  0x3a   :  { %557 = vmatpush3.bf16.msra.mxu0 %v556_v34 }
 0x100   :  { %v139_v22 = vpop.f32.mrb[0].mxu0 }
 0x101   :  { %v140_v23 = vadd.f32 %v429_v21, %v139_v22  ;;  %v473_v24 = vpop.f32.mrb[1].mxu0 }
 0x103   :  { %578 = vtanh.f32 %v140_v23 }
 0x10d   :  { %v579_v25 = vpop.eup %578 }
 0x10e   :  { %491 = vmatmul.mubr.msk.f32.vlgmr.msra.gmra.mrb[0].mxu1 %vm159_vm2, %v579_v25 }
 0x10f   :  { %528 = vmatprep.mubr.msk.f32.mxu1 %vm661_vm0, %v662_v1  ;;  %560 = vmatpush3.bf16.msra.mxu1 %v559_v37 }
 0x110   :  { %561 = vmatprep.subr.bf16.mxu1 %v660_v0 }
 0x113   :  { %563 = vmatpush3.bf16.msra.mxu1 %v562_v45 }
 0x114   :  { %564 = vmatprep.subr.bf16.mxu1 %v660_v0 }
 0x117   :  { %566 = vmatpush3.bf16.msra.mxu1 %v565_v48 }
 0x118   :  { %567 = vmatprep.subr.bf16.mxu1 %v660_v0 }
 0x11b   :  { %569 = vmatpush3.bf16.msra.mxu1 %v568_v51 }
 0x1e1   :  { %v229_v39 = vpop.f32.mrb[0].mxu1 }
 0x1e2   :  { %v230_v40 = vadd.f32 %v431_v38, %v229_v39  ;;  %v492_v41 = vpop.f32.mrb[1].mxu1 }
 0x1e4   :  { %580 = vtanh.f32 %v230_v40 }
 0x1ee   :  { %v581_v42 = vpop.eup %580 }
 0x1ef   :  { %510 = vmatmul.mubr.msk.f32.vlgmr.msra.gmra.mrb[2].mxu0 %vm159_vm2, %v581_v42 }
 0x2c2   :  { %v318_v53 = vpop.f32.mrb[2].mxu0 }
 0x2c3   :  { %v319_v54 = vadd.f32 %v433_v52, %v318_v53  ;;  %v511_v55 = vpop.f32.mrb[3].mxu0 }
 0x2c5   :  { %582 = vtanh.f32 %v319_v54 }
 0x2cf   :  { %v583_v56 = vpop.eup %582 }
 0x2d0   :  { %529 = vmatmul.mubr.msk.f32.vlgmr.msra.gmra.mrb[2].mxu1 %vm159_vm2, %v583_v56 }
 0x3a3   :  { %v407_v58 = vpop.f32.mrb[2].mxu1 }
 0x3a4   :  { %v408_v59 = vadd.f32 %v435_v57, %v407_v58  ;;  %v530_v60 = vpop.f32.mrb[3].mxu1 }
 0x3a6   :  { %412 = vst.msk [vmem:[#allocation7] sm:$0xff] %vm411_vm3, %v408_v59 }
 0x3a7   :  { %639 = shalt.err (!%p636_p6)
}
 0x3a8   :  { %s640_s0 = scalar_lea.hbm %s852_s9, 128 }
 0x3a9   :  { %p641_p7 = scmp.ne.s32.totalorder %s852_s9, %s640_s0  ;;  %p644_p8 = scmp.lt.u32.totalorder %s640_s0, %s852_s9 }
 0x3ab   :  { %p646_p9 = pnand %p644_p8, %p641_p7 }
 0x3ad   :  { %649 = shalt.err (!%p646_p9)
}
 0x3ae   :  { %422 = dma.vmem_to_hbm [thread:$0]  %s420_s28, 128, %s852_s9, [#allocation4]  }
 0x3af   :  { %654 = dma.done.wait [#allocation4], 128  }
 0x3b0   :  { %655 = vsyncadd [#allocation4], 4294967168 }
 0x3b1   :  { %426 = vsyncpa [#allocation3], 1 }
 0x3b2   :  { %427 = vsyncpa [#allocation6], 1 }
 0x3b3   :  { %428 = vsyncpa [#allocation4], 1 }

</bundles_post_ra>
